<compile_context>
chip_gen: v5e
topology: v5e:2x2
jax: 0.10.0
libtpu: 0.0.40
codegen_flags: <defaults>
</compile_context>

<pallas_src>
import functools
import math

import jax
import jax.numpy as jnp
from jax.experimental import pallas as pl
from jax.experimental.pallas import tpu as pltpu

_SQRT_2_OVER_PI = math.sqrt(2.0 / math.pi)
_MIB = 1024 * 1024


def _round_up(x, m):
    return ((x + m - 1) // m) * m


def _device_kind():
    try:
        return jax.devices()[0].device_kind.lower()
    except Exception:
        return ""


def _bf16_vpu_ok():
    # v6e / v7x have a bf16 VPU/EUP path; v5e and older do not.
    kind = _device_kind()
    return any(tag in kind for tag in ("v6", "v7", "7x", "trillium"))


def _vmem_capacity_bytes():
    # Physical VMEM per TensorCore (128 MiB on v5e/v6e, 64 MiB on v7x).
    try:
        cap = int(pltpu.get_tpu_info().vmem_capacity_bytes)
        if cap > 0:
            return max(cap, 64 * _MIB)
    except Exception:
        pass
    return 64 * _MIB  # conservative fallback (safe on every generation)


def _gelu_tanh(h_f32, compute_dtype):
    """tanh-approx GELU (matches torch.nn.GELU('tanh')).

    Math runs in `compute_dtype` (bf16 on v6e/v7x to relieve VALU pressure,
    f32 elsewhere); the matmul accumulations around it are always f32.
    """
    h = h_f32.astype(compute_dtype)
    h2 = h * h
    inner = _SQRT_2_OVER_PI * (h + 0.044715 * h2 * h)
    return 0.5 * h * (1.0 + jnp.tanh(inner))


def _mlp_kernel_resident(x_ref, w1_ref, b1_ref, w2_ref, b2_ref, o_ref, *,
                         gelu_dtype):
    """Whole W1/W2 stay VMEM-resident; one grid step per row tile.

    x_ref : (tm, C)   w1_ref: (C, H)   b1_ref: (1, H)
    w2_ref: (H, C)    b2_ref: (1, C)   o_ref : (tm, C)
    """
    h = jnp.dot(x_ref[...], w1_ref[...], preferred_element_type=jnp.float32)
    h = h + b1_ref[...].astype(jnp.float32)
    g = _gelu_tanh(h, gelu_dtype)
    y = jnp.dot(g.astype(w2_ref.dtype), w2_ref[...],
                preferred_element_type=jnp.float32)
    o_ref[...] = (y + b2_ref[...].astype(jnp.float32)).astype(o_ref.dtype)


def _mlp_kernel_tiled(x_ref, w1_ref, b1_ref, w2_ref, b2_ref, o_ref, acc_ref, *,
                      gelu_dtype):
    """(row-tile, hidden-tile) grid with f32 accumulator resident across h.

    x_ref : (tm, C)    w1_ref: (C, tH)   b1_ref: (1, tH)
    w2_ref: (tH, C)    b2_ref: (1, C)    o_ref : (tm, C)
    acc_ref: (tm, C) f32 scratch, zeroed at h==0, written back at h==last.
    """
    h_idx = pl.program_id(1)

    @pl.when(h_idx == 0)
    def _():
        acc_ref[...] = jnp.zeros_like(acc_ref)

    h = jnp.dot(x_ref[...], w1_ref[...], preferred_element_type=jnp.float32)
    h = h + b1_ref[...].astype(jnp.float32)
    g = _gelu_tanh(h, gelu_dtype)
    acc_ref[...] += jnp.dot(g.astype(w2_ref.dtype), w2_ref[...],
                            preferred_element_type=jnp.float32)

    @pl.when(h_idx == pl.num_programs(1) - 1)
    def _():
        o_ref[...] = (acc_ref[...] + b2_ref[...].astype(jnp.float32)
                      ).astype(o_ref.dtype)


def _pick_th(H, th):
    """Largest multiple of 128 <= th that divides H; else keep H whole."""
    if H % 128 != 0:
        return H
    t = max(128, (min(th, H) // 128) * 128)
    while t >= 128:
        if H % t == 0:
            return t
        t -= 128
    return H


@functools.partial(jax.jit, static_argnames=("tm", "th", "weights_resident"))
def mlp_pallas(x, w1, b1, w2, b2, *, tm=512, th=1024, weights_resident=None):
    """x: (B, T, C); w1: (C, 4C); b1: (4C,); w2: (4C, C); b2: (C,).

    Pass x / w1 / w2 as bfloat16 for the fast MXU path (accumulation is always
    f32); biases may stay f32.  For production, C should be a multiple of 128
    so output stores stay lane-dense (unmasked vst).
    """
    B, T, C = x.shape
    H = w1.shape[1]
    M = B * T

    out_dtype = x.dtype
    # Keep both MXU operands in one dtype (avoid a silent f32 MXU fallback
    # when bf16 weights are paired with f32 activations).
    if x.dtype != w1.dtype:
        x = x.astype(w1.dtype)

    in_bytes = jnp.dtype(x.dtype).itemsize
    out_bytes = jnp.dtype(out_dtype).itemsize
    w_bytes = jnp.dtype(w1.dtype).itemsize
    bias_bytes = jnp.dtype(b1.dtype).itemsize

    # GELU math dtype: bf16 on chips with a bf16 VPU (v6e/v7x), f32 on v5e.
    gelu_dtype = (jnp.bfloat16
                  if (w1.dtype == jnp.bfloat16 and _bf16_vpu_ok())
                  else jnp.float32)
    # Note: on v7x inference, fp8 weights (dequant in the f32 epilogue) would
    # halve weight traffic further; not implemented here.

    # Generation-aware VMEM budget (~80% of physical per-core VMEM).
    vmem_budget = int(0.8 * _vmem_capacity_bytes())

    # Sub-32-bit dtypes pack along sublanes: align row tiles to 32B of rows
    # (8 for f32, 16 for bf16, 32 for int8/fp8).
    row_align = max(8, 32 // in_bytes)
    m_cap = _round_up(M, row_align)

    # Resident-weight path selection.
    weight_bytes = (C * H + H * C + H + C) * w_bytes
    if weights_resident is None:
        weights_resident = weight_bytes <= vmem_budget // 3

    th_eff = H if weights_resident else _pick_th(H, th)

    def est_bytes(tm_):
        io = 2 * tm_ * C * in_bytes + 2 * tm_ * C * out_bytes  # x / out tiles
        if weights_resident:
            # weights counted double-buffered (worst case) + live f32 h/g.
            return io + 2 * weight_bytes + 3 * tm_ * H * 4
        chunk = (C * th_eff + th_eff * C + th_eff + C) * w_bytes
        return io + 2 * chunk + tm_ * C * 4 + 3 * tm_ * th_eff * 4

    # Row tile: start at the requested tm (clamped to M), grow toward 1024
    # when rows and VMEM allow, shrink if the estimate exceeds the budget.
    tm_eff = min(_round_up(tm, row_align), m_cap)
    for cand in (1024, 768, 512):
        cand = _round_up(cand, row_align)
        if cand > tm_eff and cand <= m_cap and est_bytes(cand) <= vmem_budget:
            tm_eff = cand
            break
    while tm_eff > row_align and est_bytes(tm_eff) > vmem_budget:
        tm_eff = max(row_align, _round_up(tm_eff // 2, row_align))

    M_pad = _round_up(M, tm_eff)

    x2 = x.reshape(M, C)
    if M_pad != M:
        x2 = jnp.pad(x2, ((0, M_pad - M), (0, 0)))
    b1_2 = b1.reshape(1, H)
    b2_2 = b2.reshape(1, C)

    vmem_limit = int(min(vmem_budget, max(32 * _MIB, 2 * est_bytes(tm_eff))))

    n_row_tiles = M_pad // tm_eff
    weight_reads = 1 if weights_resident else n_row_tiles
    cost = pl.CostEstimate(
        flops=4 * M_pad * C * H,                      # two M x C x H matmuls
        transcendentals=M_pad * H,                    # tanh
        bytes_accessed=int(
            M_pad * C * in_bytes + M_pad * C * out_bytes
            + weight_reads * ((w1.size + w2.size) * w_bytes
                              + (b1.size + b2.size) * bias_bytes)),
    )

    if weights_resident:
        grid = (n_row_tiles,)
        kernel = functools.partial(_mlp_kernel_resident, gelu_dtype=gelu_dtype)
        in_specs = [
            pl.BlockSpec((tm_eff, C), lambda i: (i, 0)),   # x rows (streamed)
            pl.BlockSpec((C, H), lambda i: (0, 0)),        # W1 (resident)
            pl.BlockSpec((1, H), lambda i: (0, 0)),        # b1 (resident)
            pl.BlockSpec((H, C), lambda i: (0, 0)),        # W2 (resident)
            pl.BlockSpec((1, C), lambda i: (0, 0)),        # b2 (resident)
        ]
        out_specs = pl.BlockSpec((tm_eff, C), lambda i: (i, 0))
        scratch_shapes = []
        dim_sem = ("parallel",)
    else:
        grid = (n_row_tiles, H // th_eff)                  # reduction axis last
        kernel = functools.partial(_mlp_kernel_tiled, gelu_dtype=gelu_dtype)
        in_specs = [
            pl.BlockSpec((tm_eff, C), lambda i, h: (i, 0)),   # x rows
            pl.BlockSpec((C, th_eff), lambda i, h: (0, h)),   # W1 chunk
            pl.BlockSpec((1, th_eff), lambda i, h: (0, h)),   # b1 chunk
            pl.BlockSpec((th_eff, C), lambda i, h: (h, 0)),   # W2 chunk
            pl.BlockSpec((1, C), lambda i, h: (0, 0)),        # b2
        ]
        out_specs = pl.BlockSpec((tm_eff, C), lambda i, h: (i, 0))
        scratch_shapes = [pltpu.VMEM((tm_eff, C), jnp.float32)]
        dim_sem = ("parallel", "arbitrary")

    out2 = pl.pallas_call(
        kernel,
        out_shape=jax.ShapeDtypeStruct((M_pad, C), out_dtype),
        grid_spec=pltpu.PrefetchScalarGridSpec(
            num_scalar_prefetch=0,
            grid=grid,
            in_specs=in_specs,
            out_specs=out_specs,
            scratch_shapes=scratch_shapes,
        ),
        compiler_params=pltpu.CompilerParams(
            dimension_semantics=dim_sem,
            vmem_limit_bytes=vmem_limit,
        ),
        cost_estimate=cost,
    )(x2, w1, b1_2, w2, b2_2)

    return out2[:M].reshape(B, T, C)


def _reference(x2, w1, b1, w2, b2):
    h = jnp.dot(x2, w1) + b1
    g = 0.5 * h * (1.0 + jnp.tanh(_SQRT_2_OVER_PI * (h + 0.044715 * h ** 3)))
    return jnp.dot(g, w2) + b2


if __name__ == "__main__":
    # Small GPTConfig-like sizes: batch=2, seq=8, n_embed=32 -> hidden=128.
    B, T, C = 2, 8, 32
    H = 4 * C

    key = jax.random.PRNGKey(0)
    kx, k1, k2, k3, k4 = jax.random.split(key, 5)

    x = jax.random.normal(kx, (B, T, C), dtype=jnp.float32)
    # torch.nn.Linear stores weight as (out, in); we keep the transposed
    # (in, out) layout so the kernel computes x @ W directly.
    w1 = jax.random.normal(k1, (C, H), dtype=jnp.float32) / math.sqrt(C)
    b1 = jax.random.normal(k2, (H,), dtype=jnp.float32) * 0.02
    w2 = jax.random.normal(k3, (H, C), dtype=jnp.float32) / math.sqrt(H)
    b2 = jax.random.normal(k4, (C,), dtype=jnp.float32) * 0.02

    ref = _reference(x.reshape(-1, C), w1, b1, w2, b2).reshape(B, T, C)

    # 1) Auto path (weights fit -> resident-weight kernel), f32.
    out = jax.block_until_ready(mlp_pallas(x, w1, b1, w2, b2))
    assert out.shape == (B, T, C)
    assert jnp.allclose(out, ref, atol=1e-4, rtol=1e-4), "resident f32 mismatch"

    # 2) Forced H-tiled reduction path (exercises accumulator / pl.when).
    out_t = jax.block_until_ready(
        mlp_pallas(x, w1, b1, w2, b2, weights_resident=False))
    assert jnp.allclose(out_t, ref, atol=1e-4, rtol=1e-4), "tiled f32 mismatch"

    # 3) Multi-step hidden accumulation: C=128, H=512, th=256 -> 2 h-steps.
    C2, H2 = 128, 512
    k5, k6, k7, k8, k9 = jax.random.split(jax.random.PRNGKey(1), 5)
    x_b = jax.random.normal(k5, (B, T, C2), dtype=jnp.float32)
    w1_b = jax.random.normal(k6, (C2, H2), dtype=jnp.float32) / math.sqrt(C2)
    b1_b = jax.random.normal(k7, (H2,), dtype=jnp.float32) * 0.02
    w2_b = jax.random.normal(k8, (H2, C2), dtype=jnp.float32) / math.sqrt(H2)
    b2_b = jax.random.normal(k9, (C2,), dtype=jnp.float32) * 0.02
    ref_b = _reference(x_b.reshape(-1, C2), w1_b, b1_b, w2_b, b2_b
                       ).reshape(B, T, C2)
    out_b = jax.block_until_ready(
        mlp_pallas(x_b, w1_b, b1_b, w2_b, b2_b, th=256, weights_resident=False))
    assert jnp.allclose(out_b, ref_b, atol=1e-3, rtol=1e-3), "multi-step mismatch"

    # 4) bf16 MXU-input path (f32 accumulation): looser tolerance.
    out_bf16 = jax.block_until_ready(
        mlp_pallas(x.astype(jnp.bfloat16), w1.astype(jnp.bfloat16), b1,
                   w2.astype(jnp.bfloat16), b2))
    assert out_bf16.dtype == jnp.bfloat16
    assert jnp.allclose(out_bf16.astype(jnp.float32), ref,
                        atol=1e-1, rtol=1e-1), "bf16 mismatch vs reference"

    print("KERNEL_OK")
</pallas_src>

<mosaic_0001>
module attributes {stable_mosaic.version = 11 : i64} {
  func.func @_mlp_kernel_resident(%arg0: i32, %arg1: memref<16x32xf32, #tpu.memory_space<vmem>>, %arg2: memref<32x128xf32, #tpu.memory_space<vmem>>, %arg3: memref<1x128xf32, #tpu.memory_space<vmem>>, %arg4: memref<128x32xf32, #tpu.memory_space<vmem>>, %arg5: memref<1x32xf32, #tpu.memory_space<vmem>>, %arg6: memref<16x32xf32, #tpu.memory_space<vmem>>) attributes {dimension_semantics = [#tpu.dimension_semantics<parallel>], iteration_bounds = array<i64: 1>, scalar_prefetch = 0 : i64, scratch_operands = 0 : i64, tpu.core_type = #tpu.core_type<tc>, window_params = [{transform_indices = @transform_0, window_bounds = array<i64: 16, 32>}, {pipeline_mode = #tpu.pipeline_mode<synchronous>, transform_indices = @transform_1, window_bounds = array<i64: 32, 128>}, {pipeline_mode = #tpu.pipeline_mode<synchronous>, transform_indices = @transform_2, window_bounds = array<i64: 1, 128>}, {pipeline_mode = #tpu.pipeline_mode<synchronous>, transform_indices = @transform_3, window_bounds = array<i64: 128, 32>}, {pipeline_mode = #tpu.pipeline_mode<synchronous>, transform_indices = @transform_4, window_bounds = array<i64: 1, 32>}, {transform_indices = @transform_5, window_bounds = array<i64: 16, 32>}]} {
    %c0 = arith.constant 0 : index
    %c0_0 = arith.constant 0 : index
    %0 = vector.load %arg1[%c0, %c0_0] : memref<16x32xf32, #tpu.memory_space<vmem>>, vector<16x32xf32>
    %c0_1 = arith.constant 0 : index
    %c0_2 = arith.constant 0 : index
    %1 = vector.load %arg2[%c0_1, %c0_2] : memref<32x128xf32, #tpu.memory_space<vmem>>, vector<32x128xf32>
    %cst = arith.constant dense<0.000000e+00> : vector<16x128xf32>
    %2 = tpu.matmul %0, %1, %cst {dimension_numbers = #tpu.dot_dimension_numbers<[1], [0], [0], [1], [0, 0, 1, 1], [], []>} : vector<16x32xf32>, vector<32x128xf32>, vector<16x128xf32> -> vector<16x128xf32>
    %c0_3 = arith.constant 0 : index
    %c0_4 = arith.constant 0 : index
    %3 = vector.load %arg3[%c0_3, %c0_4] : memref<1x128xf32, #tpu.memory_space<vmem>>, vector<1x128xf32>
    %4 = vector.broadcast %3 : vector<1x128xf32> to vector<16x128xf32>
    %5 = arith.addf %2, %4 : vector<16x128xf32>
    %6 = arith.mulf %5, %5 : vector<16x128xf32>
    %cst_5 = arith.constant 4.471500e-02 : f32
    %7 = vector.broadcast %cst_5 : f32 to vector<16x128xf32>
    %8 = arith.mulf %7, %6 : vector<16x128xf32>
    %9 = arith.mulf %8, %5 : vector<16x128xf32>
    %10 = arith.addf %5, %9 : vector<16x128xf32>
    %cst_6 = arith.constant 0.797884583 : f32
    %11 = vector.broadcast %cst_6 : f32 to vector<16x128xf32>
    %12 = arith.mulf %11, %10 : vector<16x128xf32>
    %cst_7 = arith.constant 5.000000e-01 : f32
    %13 = vector.broadcast %cst_7 : f32 to vector<16x128xf32>
    %14 = arith.mulf %13, %5 : vector<16x128xf32>
    %15 = math.tanh %12 : vector<16x128xf32>
    %cst_8 = arith.constant 1.000000e+00 : f32
    %16 = vector.broadcast %cst_8 : f32 to vector<16x128xf32>
    %17 = arith.addf %16, %15 : vector<16x128xf32>
    %18 = arith.mulf %14, %17 : vector<16x128xf32>
    %c0_9 = arith.constant 0 : index
    %c0_10 = arith.constant 0 : index
    %19 = vector.load %arg4[%c0_9, %c0_10] : memref<128x32xf32, #tpu.memory_space<vmem>>, vector<128x32xf32>
    %cst_11 = arith.constant dense<0.000000e+00> : vector<16x32xf32>
    %20 = tpu.matmul %18, %19, %cst_11 {dimension_numbers = #tpu.dot_dimension_numbers<[1], [0], [0], [1], [0, 0, 1, 1], [], []>} : vector<16x128xf32>, vector<128x32xf32>, vector<16x32xf32> -> vector<16x32xf32>
    %c0_12 = arith.constant 0 : index
    %c0_13 = arith.constant 0 : index
    %21 = vector.load %arg5[%c0_12, %c0_13] : memref<1x32xf32, #tpu.memory_space<vmem>>, vector<1x32xf32>
    %22 = vector.broadcast %21 : vector<1x32xf32> to vector<16x32xf32>
    %23 = arith.addf %20, %22 : vector<16x32xf32>
    %c0_14 = arith.constant 0 : index
    %c0_15 = arith.constant 0 : index
    %24 = vector.load %arg6[%c0_14, %c0_15] : memref<16x32xf32, #tpu.memory_space<vmem>>, vector<16x32xf32>
    tpu.vector_store %arg6[%c0_14, %c0_15], %23 {strides = array<i32>} : memref<16x32xf32, #tpu.memory_space<vmem>>, vector<16x32xf32>,
    return
  }
  func.func @transform_0(%arg0: i32) -> (i32, i32) {
    %c0_i32 = arith.constant 0 : i32
    %c0_i32_0 = arith.constant 0 : i32
    return %arg0, %c0_i32 : i32, i32
  }
  func.func @transform_1(%arg0: i32) -> (i32, i32) {
    %c0_i32 = arith.constant 0 : i32
    %c0_i32_0 = arith.constant 0 : i32
    %c0_i32_1 = arith.constant 0 : i32
    return %c0_i32, %c0_i32_0 : i32, i32
  }
  func.func @transform_2(%arg0: i32) -> (i32, i32) {
    %c0_i32 = arith.constant 0 : i32
    %c0_i32_0 = arith.constant 0 : i32
    %c0_i32_1 = arith.constant 0 : i32
    return %c0_i32, %c0_i32_0 : i32, i32
  }
  func.func @transform_3(%arg0: i32) -> (i32, i32) {
    %c0_i32 = arith.constant 0 : i32
    %c0_i32_0 = arith.constant 0 : i32
    %c0_i32_1 = arith.constant 0 : i32
    return %c0_i32, %c0_i32_0 : i32, i32
  }
  func.func @transform_4(%arg0: i32) -> (i32, i32) {
    %c0_i32 = arith.constant 0 : i32
    %c0_i32_0 = arith.constant 0 : i32
    %c0_i32_1 = arith.constant 0 : i32
    return %c0_i32, %c0_i32_0 : i32, i32
  }
  func.func @transform_5(%arg0: i32) -> (i32, i32) {
    %c0_i32 = arith.constant 0 : i32
    %c0_i32_0 = arith.constant 0 : i32
    return %arg0, %c0_i32 : i32, i32
  }
}

</mosaic_0001>

<bundles_post_ra>
// kernel: mlp_pallas.1
= control target key start
LH: loop header
LB: loop body
LE: loop exit
PB: predicated region body
PF: predicated region fallthrough
CT: control target
= control target key end

     0   :  { %s307_s0 = inlined_call_operand.vmem [shape: f32[16,32], index: 0, kind: input, shape index: {}]   ;;  %s308_s1 = inlined_call_operand.vmem [shape: f32[32,128], index: 1, kind: input, shape index: {}]   ;;  %s309_s2 = inlined_call_operand.vmem [shape: f32[1,128], index: 2, kind: input, shape index: {}]   ;;  %s310_s3 = inlined_call_operand.vmem [shape: f32[128,32], index: 3, kind: input, shape index: {}]   ;;  %s311_s4 = inlined_call_operand.vmem [shape: f32[1,32], index: 4, kind: input, shape index: {}]   ;;  %s312_s5 = inlined_call_operand.hbm [shape: f32[16,32], index: 5, kind: output, shape index: {}]  }
   0x1   :  { %v26_v0 = vld [vmem:[%s308_s1 + $0x18] sm:$0xff]  ;;  %v25_v1 = vld [vmem:[%s308_s1 + $0x10] sm:$0xff]  ;;  %v24_v2 = vld [vmem:[%s308_s1 + $0x8] sm:$0xff] }
   0x2   :  { %50 = vmatpush.msra.mxu0 %v26_v0  ;;  %v94_v3 = vld [vmem:[%s310_s3 + $0x78] sm:$0xff]  ;;  %v93_v4 = vld [vmem:[%s310_s3 + $0x70] sm:$0xff]  ;;  %v23_v5 = vld [vmem:[%s308_s1] sm:$0xff] }
   0x3   :  { %99 = vmatpush.msra.mxu1 %v94_v3  ;;  %v92_v6 = vld [vmem:[%s310_s3 + $0x68] sm:$0xff]  ;;  %144 = vmatpush.msra.mxu2 %v94_v3 }
   0x4   :  { %51 = vmatpush.msra.mxu0 %v25_v1 }
   0x5   :  { %10 = vsyncpa [#allocation3], 0  ;;  %v21_v7 = vld [vmem:[%s307_s0] sm:$0xff]  ;;  %vm31_vm0 = vcmask 261120   ;;  %100 = vmatpush.msra.mxu1 %v93_v4  ;;  %145 = vmatpush.msra.mxu2 %v93_v4  ;;  %v22_v9 = vld [vmem:[%s307_s0 + $0x8] sm:$0xff]  ;;  %s195_s11 = smov [#allocation2]  }
   0x6   :  { %52 = vmatpush.msra.mxu0 %v24_v2  ;;  %v91_v8 = vld [vmem:[%s310_s3 + $0x60] sm:$0xff]  ;;  %v90_v10 = vld [vmem:[%s310_s3 + $0x58] sm:$0xff]  ;;  %v89_v11 = vld [vmem:[%s310_s3 + $0x50] sm:$0xff]  ;;  %s128_s12 = sshll.u32 %s195_s11, 4  ;;  %s130_s15 = sshll.u32 %s312_s5, 4  ;;  %s129_s12 = int_to_ptr.vmem [resolvable:$true] %s128_s12  ;;  %s131_s15 = int_to_ptr.hbm [resolvable:$true] %s130_s15 }
   0x7   :  { %101 = vmatpush.msra.mxu1 %v92_v6  ;;  %146 = vmatpush.msra.mxu2 %v92_v6  ;;  %v88_v12 = vld [vmem:[%s310_s3 + $0x48] sm:$0xff]  ;;  %v87_v13 = vld [vmem:[%s310_s3 + $0x40] sm:$0xff]  ;;  %v86_v14 = vld [vmem:[%s310_s3 + $0x38] sm:$0xff]  ;;  %s196_s16 = smov 128   ;;  %s197_s17 = smov 8  }
   0x8   :  { %53 = vmatpush.msra.mxu0 %v23_v5  ;;  %v85_v15 = vld [vmem:[%s310_s3 + $0x30] sm:$0xff]  ;;  %v84_v16 = vld [vmem:[%s310_s3 + $0x28] sm:$0xff]  ;;  %v83_v17 = vld [vmem:[%s310_s3 + $0x20] sm:$0xff] }
   0x9   :  { %142 = vmatmul.msk.f32.vlgmr.msra.gmra.mxu0 %vm31_vm0, %v21_v7  ;;  %102 = vmatpush.msra.mxu1 %v91_v8  ;;  %v82_v18 = vld [vmem:[%s310_s3 + $0x18] sm:$0xff]  ;;  %v81_v19 = vld [vmem:[%s310_s3 + $0x10] sm:$0xff]  ;;  %v80_v20 = vld [vmem:[%s310_s3 + $0x8] sm:$0xff] }
   0xa   :  { %147 = vmatpush.msra.mxu2 %v91_v8  ;;  %v79_v21 = vld [vmem:[%s310_s3] sm:$0xff] }
   0xb   :  { %103 = vmatpush.msra.mxu1 %v90_v10  ;;  %v163_v22 = vld [vmem:[%s309_s2] ss:$0 sm:$0xff] }
   0xc   :  { %148 = vmatpush.msra.mxu2 %v90_v10  ;;  %v164_v45 = vld [vmem:[%s311_s4] ss:$0 sm:$0xff] }
   0xd   :  { %104 = vmatpush.msra.mxu1 %v89_v11 }
   0xe   :  { %149 = vmatpush.msra.mxu2 %v89_v11 }
   0xf   :  { %105 = vmatpush.msra.mxu1 %v88_v12 }
  0x10   :  { %150 = vmatpush.msra.mxu2 %v88_v12 }
  0x11   :  { %143 = vmatmul.msk.f32.gmra.mxu0 %vm31_vm0, %v22_v9  ;;  %106 = vmatpush.msra.mxu1 %v87_v13 }
  0x12   :  { %151 = vmatpush.msra.mxu2 %v87_v13 }
  0x13   :  { %107 = vmatpush.msra.mxu1 %v86_v14 }
  0x14   :  { %152 = vmatpush.msra.mxu2 %v86_v14 }
  0x15   :  { %108 = vmatpush.msra.mxu1 %v85_v15 }
  0x16   :  { %153 = vmatpush.msra.mxu2 %v85_v15 }
  0x17   :  { %109 = vmatpush.msra.mxu1 %v84_v16 }
  0x18   :  { %154 = vmatpush.msra.mxu2 %v84_v16 }
  0x19   :  { %110 = vmatpush.msra.mxu1 %v83_v17 }
  0x1a   :  { %155 = vmatpush.msra.mxu2 %v83_v17 }
  0x1b   :  { %111 = vmatpush.msra.mxu1 %v82_v18 }
  0x1c   :  { %156 = vmatpush.msra.mxu2 %v82_v18 }
  0x1d   :  { %112 = vmatpush.msra.mxu1 %v81_v19 }
  0x1e   :  { %157 = vmatpush.msra.mxu2 %v81_v19 }
  0x1f   :  { %113 = vmatpush.msra.mxu1 %v80_v20 }
  0x20   :  { %158 = vmatpush.msra.mxu2 %v80_v20 }
  0x21   :  { %114 = vmatpush.msra.mxu1 %v79_v21 }
  0x22   :  { %159 = vmatpush.msra.mxu2 %v79_v21 }
  0x86   :  { %v55_v23 = vpop.f32.mrf.mxu0 }
  0x87   :  { %v56_v24 = vadd.f32 %v163_v22, %v55_v23 }
  0x89   :  { %v61_v25 = vmul.f32 %v56_v24, %v56_v24  ;;  %v71_v38 = vmul.f32 0.5, %v56_v24 }
  0x8b   :  { %v63_v26 = vmul.f32 0.044715, %v61_v25 }
  0x8d   :  { %v65_v27 = vmul.f32 %v63_v26, %v56_v24 }
  0x8e   :  { %v58_v28 = vpop.f32.mrf.mxu0 }
  0x8f   :  { %v59_v29 = vadd.f32 %v163_v22, %v58_v28  ;;  %v67_v30 = vadd.f32 %v65_v27, %v56_v24 }
  0x91   :  { %v62_v31 = vmul.f32 %v59_v29, %v59_v29  ;;  %v69_v32 = vmul.f32 0.7978846, %v67_v30  ;;  %v72_v42 = vmul.f32 0.5, %v59_v29 }
  0x93   :  { %v64_v33 = vmul.f32 0.044715, %v62_v31  ;;  %165 = vtanh.f32 %v69_v32 }
  0x95   :  { %v66_v34 = vmul.f32 %v64_v33, %v59_v29 }
  0x97   :  { %v68_v35 = vadd.f32 %v66_v34, %v59_v29 }
  0x99   :  { %v166_v36 = vpop.eup %165  ;;  %v70_v37 = vmul.f32 0.7978846, %v68_v35 }
  0x9a   :  { %v75_v39 = vadd.f32 1.0, %v166_v36 }
  0x9b   :  { %167 = vtanh.f32 %v70_v37 }
  0x9c   :  { %v77_v40 = vmul.f32 %v75_v39, %v71_v38 }
  0x9e   :  { %115 = vmatmul.f32.vlgmr.msra.gmra.mxu1 %v77_v40 }
  0xa1   :  { %v168_v41 = vpop.eup %167 }
  0xa2   :  { %v76_v43 = vadd.f32 1.0, %v168_v41 }
  0xa4   :  { %v78_v44 = vmul.f32 %v76_v43, %v72_v42 }
  0xa6   :  { %118 = vmatmul.f32.vlgmr.msra.gmra.mxu2 %v78_v44 }
 0x11b   :  { %v116_v46 = vpop.f32.mrf.mxu1 }
 0x11c   :  { %v117_v47 = vadd.f32 %v164_v45, %v116_v46 }
 0x11e   :  { %122 = vst.msk [vmem:[#allocation2] sm:$0xff] %vm31_vm0, %v117_v47 }
 0x129   :  { %v119_v48 = vpop.f32.mrf.mxu2 }
 0x12a   :  { %v120_v49 = vadd.f32 %v164_v45, %v119_v48 }
 0x12c   :  { %123 = vst.msk [vmem:[#allocation2 + $0x8] sm:$0xff] %vm31_vm0, %v120_v49 }
 0x12d   :  { %136 = dma.vmem_to_hbm [thread:$0]  %s129_s12, 256, %s131_s15, [#allocation3], %s196_s16, %s196_s16, %s197_s17  }
 0x12e   :  { %193 = dma.done.wait [#allocation3], 256  }
 0x12f   :  { %194 = vsyncadd [#allocation3], 4294967040 }
 0x130   :  { %141 = vsyncpa [#allocation3], 1 }

</bundles_post_ra>
